<compile_context>
chip_gen: v7x
topology: tpu7x:2x2x1
jax: 0.10.0
libtpu: 0.0.40
codegen_flags: <defaults>
</compile_context>

<pallas_src>
import functools

import jax
import jax.numpy as jnp
import numpy as np
from jax import lax
from jax.experimental import pallas as pl
from jax.experimental.pallas import tpu as pltpu


def _triplet_row_kernel(x_row_ref, x_all_ref, sq_col_ref, t_row_ref, t_col_ref,
                        out_ref, *, margin, norm):
    xr = x_row_ref[...]          # (TM, D) f32  anchor rows for this grid step
    xa = x_all_ref[...]          # (N,  D) f32  all samples (resident in VMEM)
    tr = t_row_ref[...]          # (TM, 1) int32
    tc = t_col_ref[...]          # (1,  N) int32

    # gram[i, j] = <xr_i, xa_j>; contract dim 1 of both operands so no explicit
    # transpose of xa is materialized before the MXU.
    gram = lax.dot_general(xr, xa, (((1,), (1,)), ((), ())),
                           preferred_element_type=jnp.float32)        # (TM, N)

    if norm:
        # Rows are unit-norm (normalized in the wrapper): ||a-b||^2 = 2 - 2<a,b>.
        d2 = 2.0 - 2.0 * gram
    else:
        sq_r = jnp.sum(xr * xr, axis=1, keepdims=True)                # (TM, 1)
        d2 = sq_r + sq_col_ref[...] - 2.0 * gram                      # (TM, N)

    # Positive mask (same label). Built once, used for both reductions.
    mask = tr == tc                                                   # (TM, N)
    neg_inf = jnp.float32(-jnp.inf)
    pos_inf = jnp.float32(jnp.inf)

    # Reduce on squared distances (sqrt is monotonic); sqrt only the (TM, 1)
    # results instead of the whole (TM, N) tile.
    ap2 = jnp.max(jnp.where(mask, d2, neg_inf), axis=1, keepdims=True)
    an2 = jnp.min(jnp.where(mask, pos_inf, d2), axis=1, keepdims=True)
    dist_ap = jnp.sqrt(jnp.maximum(ap2, jnp.float32(1e-12)))
    dist_an = jnp.sqrt(jnp.maximum(an2, jnp.float32(1e-12)))

    if margin is not None:
        # MarginRankingLoss(y=1): max(0, -(an - ap) + margin)
        per = jnp.maximum(dist_ap - dist_an + jnp.float32(margin), 0.0)
    else:
        # SoftMarginLoss(y=1): log(1 + exp(-(an - ap))) == softplus(ap - an),
        # numerically stable form.
        z = dist_ap - dist_an
        per = jnp.maximum(z, 0.0) + jnp.log1p(jnp.exp(-jnp.abs(z)))

    out_ref[...] = per                                                # (TM, 1)


def _choose_row_tile(n):
    """Row-tile size TM: multiple of 8 (sublane), MXU-friendly, and sized so the
    live (TM, N) f32 temporaries (~4x TM*N*4B) stay inside a conservative VMEM
    budget that fits every generation (v7x has only 64 MiB physical VMEM)."""
    if n <= 256:
        return max(8, ((n + 7) // 8) * 8)          # single block
    budget = 24 * 1024 * 1024                      # bytes for ~4 (TM, N) f32 temps
    for tm in (512, 256, 128, 64):
        if 4 * tm * n * 4 <= budget:
            return tm
    return 8                                       # pathological N; RHS dominates anyway


def triplet_loss(inputs, targets, *, margin=None, norm=False):
    """Batch-hard triplet loss. inputs: (N, D) float; targets: (N,) int labels."""
    x = inputs.astype(jnp.float32)
    n, d = x.shape
    t = targets.astype(jnp.int32)

    if norm:
        # F.normalize(p=2, dim=1, eps=1e-12) via rsqrt instead of sqrt + divide.
        sumsq = jnp.sum(x * x, axis=1, keepdims=True)
        x = x * lax.rsqrt(jnp.maximum(sumsq, jnp.float32(1e-24)))

    tm = _choose_row_tile(n)
    n_pad = ((n + tm - 1) // tm) * tm
    x_rows = jnp.pad(x, ((0, n_pad - n), (0, 0))) if n_pad != n else x
    t_rows = (jnp.pad(t, (0, n_pad - n)) if n_pad != n else t).reshape(n_pad, 1)
    t_cols = t.reshape(1, n)
    sq_cols = jnp.sum(x * x, axis=1).reshape(1, n)   # (1, N); unused when norm=True

    kernel = functools.partial(_triplet_row_kernel, margin=margin, norm=norm)

    per_row = pl.pallas_call(
        kernel,
        out_shape=jax.ShapeDtypeStruct((n_pad, 1), jnp.float32),
        grid=(n_pad // tm,),
        in_specs=[
            pl.BlockSpec((tm, d), lambda i: (i, 0)),   # anchor row block
            pl.BlockSpec((n, d), lambda i: (0, 0)),    # all samples, resident
            pl.BlockSpec((1, n), lambda i: (0, 0)),    # column squared norms
            pl.BlockSpec((tm, 1), lambda i: (i, 0)),   # labels, row layout
            pl.BlockSpec((1, n), lambda i: (0, 0)),    # labels, column layout
        ],
        out_specs=pl.BlockSpec((tm, 1), lambda i: (i, 0)),
        compiler_params=pltpu.CompilerParams(
            dimension_semantics=("parallel",),         # independent row blocks
            vmem_limit_bytes=48 * 1024 * 1024,         # > default scoped, < v7x physical
        ),
    )(x_rows, x, sq_cols, t_rows, t_cols)

    # Mean over the n real anchors; padded rows are sliced away.
    return jnp.mean(per_row[:n, 0])


def _triplet_loss_ref(inputs, targets, *, margin=None, norm=False):
    """Pure-JAX reference mirroring the PyTorch module."""
    x = inputs.astype(jnp.float32)
    if norm:
        x = x / jnp.maximum(jnp.linalg.norm(x, axis=1, keepdims=True), 1e-12)
    sq = jnp.sum(x * x, axis=1, keepdims=True)
    gram = jnp.dot(x, x.T, precision=lax.Precision.HIGHEST)
    dist = jnp.sqrt(jnp.clip(sq + sq.T - 2.0 * gram, 1e-12))
    mask = targets[:, None] == targets[None, :]
    dist_ap = jnp.max(jnp.where(mask, dist, -jnp.inf), axis=1)
    dist_an = jnp.min(jnp.where(mask, jnp.inf, dist), axis=1)
    if margin is not None:
        return jnp.mean(jnp.maximum(dist_ap - dist_an + margin, 0.0))
    return jnp.mean(jax.nn.softplus(dist_ap - dist_an))


if __name__ == "__main__":
    key = jax.random.PRNGKey(0)
    n, d = 8, 128
    inputs = jax.random.normal(key, (n, d), dtype=jnp.float32)
    # Labels: 4 identities, 2 samples each -> every anchor has >=1 pos and >=1 neg.
    targets = jnp.array([0, 0, 1, 1, 2, 2, 3, 3], dtype=jnp.int32)

    # margin-based variant (MarginRankingLoss path)
    loss_margin = triplet_loss(inputs, targets, margin=0.3, norm=False)
    jax.block_until_ready(loss_margin)
    ref_margin = _triplet_loss_ref(inputs, targets, margin=0.3, norm=False)

    # soft-margin variant (SoftMarginLoss path) with L2-normalized features
    loss_soft = triplet_loss(inputs, targets, margin=None, norm=True)
    jax.block_until_ready(loss_soft)
    ref_soft = _triplet_loss_ref(inputs, targets, margin=None, norm=True)

    assert np.allclose(np.asarray(loss_margin), np.asarray(ref_margin),
                       rtol=1e-4, atol=1e-4), (loss_margin, ref_margin)
    assert np.allclose(np.asarray(loss_soft), np.asarray(ref_soft),
                       rtol=1e-4, atol=1e-4), (loss_soft, ref_soft)
    print("KERNEL_OK")
</pallas_src>

<mosaic_0001>
module attributes {stable_mosaic.version = 11 : i64} {
  func.func @_triplet_row_kernel(%arg0: i32, %arg1: memref<8x128xf32, #tpu.memory_space<vmem>>, %arg2: memref<8x128xf32, #tpu.memory_space<vmem>>, %arg3: memref<1x8xf32, #tpu.memory_space<vmem>>, %arg4: memref<8x1xi32, #tpu.memory_space<vmem>>, %arg5: memref<1x8xi32, #tpu.memory_space<vmem>>, %arg6: memref<8x1xf32, #tpu.memory_space<vmem>>) attributes {dimension_semantics = [#tpu.dimension_semantics<parallel>], iteration_bounds = array<i64: 1>, scalar_prefetch = 0 : i64, scratch_operands = 0 : i64, tpu.core_type = #tpu.core_type<tc>, window_params = [{transform_indices = @transform_0, window_bounds = array<i64: 8, 128>}, {pipeline_mode = #tpu.pipeline_mode<synchronous>, transform_indices = @transform_1, window_bounds = array<i64: 8, 128>}, {pipeline_mode = #tpu.pipeline_mode<synchronous>, transform_indices = @transform_2, window_bounds = array<i64: 1, 8>}, {transform_indices = @transform_3, window_bounds = array<i64: 8, 1>}, {pipeline_mode = #tpu.pipeline_mode<synchronous>, transform_indices = @transform_4, window_bounds = array<i64: 1, 8>}, {transform_indices = @transform_5, window_bounds = array<i64: 8, 1>}]} {
    %c0 = arith.constant 0 : index
    %c0_0 = arith.constant 0 : index
    %0 = vector.load %arg1[%c0, %c0_0] : memref<8x128xf32, #tpu.memory_space<vmem>>, vector<8x128xf32>
    %c0_1 = arith.constant 0 : index
    %c0_2 = arith.constant 0 : index
    %1 = vector.load %arg2[%c0_1, %c0_2] : memref<8x128xf32, #tpu.memory_space<vmem>>, vector<8x128xf32>
    %c0_3 = arith.constant 0 : index
    %c0_4 = arith.constant 0 : index
    %2 = vector.load %arg4[%c0_3, %c0_4] : memref<8x1xi32, #tpu.memory_space<vmem>>, vector<8x1xi32>
    %c0_5 = arith.constant 0 : index
    %c0_6 = arith.constant 0 : index
    %3 = vector.load %arg5[%c0_5, %c0_6] : memref<1x8xi32, #tpu.memory_space<vmem>>, vector<1x8xi32>
    %cst = arith.constant dense<0.000000e+00> : vector<8x8xf32>
    %4 = tpu.matmul %0, %1, %cst {dimension_numbers = #tpu.dot_dimension_numbers<[1], [1], [0], [0], [0, 0, 1, 0], [], []>} : vector<8x128xf32>, vector<8x128xf32>, vector<8x8xf32> -> vector<8x8xf32>
    %5 = arith.mulf %0, %0 : vector<8x128xf32>
    %cst_7 = arith.constant dense<0.000000e+00> : vector<8xf32>
    %6 = vector.multi_reduction <add>, %5, %cst_7 [1] : vector<8x128xf32> to vector<8xf32>
    %7 = vector.shape_cast %6 : vector<8xf32> to vector<8x1xf32>
    %c0_8 = arith.constant 0 : index
    %c0_9 = arith.constant 0 : index
    %8 = vector.load %arg3[%c0_8, %c0_9] : memref<1x8xf32, #tpu.memory_space<vmem>>, vector<1x8xf32>
    %9 = vector.broadcast %7 : vector<8x1xf32> to vector<8x8xf32>
    %10 = vector.broadcast %8 : vector<1x8xf32> to vector<8x8xf32>
    %11 = arith.addf %9, %10 : vector<8x8xf32>
    %cst_10 = arith.constant 2.000000e+00 : f32
    %12 = vector.broadcast %cst_10 : f32 to vector<8x8xf32>
    %13 = arith.mulf %12, %4 : vector<8x8xf32>
    %14 = arith.subf %11, %13 : vector<8x8xf32>
    %15 = vector.broadcast %2 : vector<8x1xi32> to vector<8x8xi32>
    %16 = vector.broadcast %3 : vector<1x8xi32> to vector<8x8xi32>
    %17 = arith.cmpi eq, %15, %16 : vector<8x8xi32>
    %cst_11 = arith.constant 0xFF800000 : f32
    %18 = vector.broadcast %cst_11 : f32 to vector<8x8xf32>
    %19 = arith.select %17, %14, %18 : vector<8x8xi1>, vector<8x8xf32>
    %cst_12 = arith.constant dense<0xFF800000> : vector<8xf32>
    %20 = vector.multi_reduction <maximumf>, %19, %cst_12 [1] : vector<8x8xf32> to vector<8xf32>
    %21 = vector.shape_cast %20 : vector<8xf32> to vector<8x1xf32>
    %cst_13 = arith.constant 0x7F800000 : f32
    %22 = vector.broadcast %cst_13 : f32 to vector<8x8xf32>
    %23 = arith.select %17, %22, %14 : vector<8x8xi1>, vector<8x8xf32>
    %cst_14 = arith.constant dense<0x7F800000> : vector<8xf32>
    %24 = vector.multi_reduction <minimumf>, %23, %cst_14 [1] : vector<8x8xf32> to vector<8xf32>
    %25 = vector.shape_cast %24 : vector<8xf32> to vector<8x1xf32>
    %cst_15 = arith.constant 9.99999996E-13 : f32
    %26 = vector.broadcast %cst_15 : f32 to vector<8x1xf32>
    %27 = arith.maximumf %21, %26 : vector<8x1xf32>
    %28 = math.sqrt %27 : vector<8x1xf32>
    %cst_16 = arith.constant 9.99999996E-13 : f32
    %29 = vector.broadcast %cst_16 : f32 to vector<8x1xf32>
    %30 = arith.maximumf %25, %29 : vector<8x1xf32>
    %31 = math.sqrt %30 : vector<8x1xf32>
    %32 = arith.subf %28, %31 : vector<8x1xf32>
    %cst_17 = arith.constant 3.000000e-01 : f32
    %33 = vector.broadcast %cst_17 : f32 to vector<8x1xf32>
    %34 = arith.addf %32, %33 : vector<8x1xf32>
    %cst_18 = arith.constant 0.000000e+00 : f32
    %35 = vector.broadcast %cst_18 : f32 to vector<8x1xf32>
    %36 = arith.maximumf %34, %35 : vector<8x1xf32>
    %c0_19 = arith.constant 0 : index
    %c0_20 = arith.constant 0 : index
    %37 = vector.load %arg6[%c0_19, %c0_20] : memref<8x1xf32, #tpu.memory_space<vmem>>, vector<8x1xf32>
    tpu.vector_store %arg6[%c0_19, %c0_20], %36 {strides = array<i32>} : memref<8x1xf32, #tpu.memory_space<vmem>>, vector<8x1xf32>,
    return
  }
  func.func @transform_0(%arg0: i32) -> (i32, i32) {
    %c0_i32 = arith.constant 0 : i32
    %c0_i32_0 = arith.constant 0 : i32
    return %arg0, %c0_i32 : i32, i32
  }
  func.func @transform_1(%arg0: i32) -> (i32, i32) {
    %c0_i32 = arith.constant 0 : i32
    %c0_i32_0 = arith.constant 0 : i32
    %c0_i32_1 = arith.constant 0 : i32
    return %c0_i32, %c0_i32_0 : i32, i32
  }
  func.func @transform_2(%arg0: i32) -> (i32, i32) {
    %c0_i32 = arith.constant 0 : i32
    %c0_i32_0 = arith.constant 0 : i32
    %c0_i32_1 = arith.constant 0 : i32
    return %c0_i32, %c0_i32_0 : i32, i32
  }
  func.func @transform_3(%arg0: i32) -> (i32, i32) {
    %c0_i32 = arith.constant 0 : i32
    %c0_i32_0 = arith.constant 0 : i32
    return %arg0, %c0_i32 : i32, i32
  }
  func.func @transform_4(%arg0: i32) -> (i32, i32) {
    %c0_i32 = arith.constant 0 : i32
    %c0_i32_0 = arith.constant 0 : i32
    %c0_i32_1 = arith.constant 0 : i32
    return %c0_i32, %c0_i32_0 : i32, i32
  }
  func.func @transform_5(%arg0: i32) -> (i32, i32) {
    %c0_i32 = arith.constant 0 : i32
    %c0_i32_0 = arith.constant 0 : i32
    return %arg0, %c0_i32 : i32, i32
  }
}

</mosaic_0001>

<bundles_post_ra>
// kernel: tpu_custom_call.1
= control target key start
LH: loop header
LB: loop body
LE: loop exit
PB: predicated region body
PF: predicated region fallthrough
CT: control target
= control target key end

     0   :  { %10 = vsyncpa [#allocation3], 0  ;;  %s204_s18 = smov [#allocation2]   ;;  %s265_s0 = inlined_call_operand.vmem [shape: f32[8,128], index: 0, kind: input, shape index: {}]   ;;  %s266_s1 = inlined_call_operand.hbm [shape: f32[8,128], index: 1, kind: input, shape index: {}]   ;;  %s267_s2 = inlined_call_operand.vmem [shape: f32[1,8], index: 2, kind: input, shape index: {}]   ;;  %s268_s3 = inlined_call_operand.vmem [shape: s32[8,1], index: 3, kind: input, shape index: {}]   ;;  %s269_s4 = inlined_call_operand.vmem [shape: s32[1,8], index: 4, kind: input, shape index: {}]   ;;  %s270_s5 = inlined_call_operand.vmem [shape: f32[8,1], index: 5, kind: output, shape index: {}]  }
   0x1   :  { %s19_s19 = sshll.u32 %s204_s18, 4  ;;  %s180_s22 = scalar_lea.hbm %s266_s1, 128  ;;  %s20_s19 = int_to_ptr.vmem [resolvable:$true] %s19_s19 }
   0x2   :  { %p181_p0 = scmp.ne.s32.totalorder %s266_s1, %s180_s22  ;;  %p184_p1 = scmp.lt.u32.totalorder %s180_s22, %s266_s1 }
   0x4   :  { %p186_p2 = pnand %p184_p1, %p181_p0 }
   0x6   :  { %189 = shalt.err (!%p186_p2)
}
   0x7   :  { %s190_s27 = scalar_lea.vmem %s20_s19, 128  ;;  %p195_p4 = scmp.lt.s32.totalorder %s20_s19, %s20_s19 }
   0x8   :  { %p191_p3 = scmp.ne.s32.totalorder %s20_s19, %s190_s27  ;;  %p196_p5 = scmp.lt.s32.totalorder %s190_s27, %s190_s27 }
   0xa   :  { %p197_p6 = por %p196_p5, %p195_p4 }
   0xc   :  { %p198_p7 = pnand %p197_p6, %p191_p3 }
   0xe   :  { %201 = shalt.err (!%p198_p7)
}
   0xf   :  { %22 = dma.hbm_to_vmem [thread:$0]  %s266_s1, 128, %s20_s19, [#allocation3]  }
  0x10   :  { %202 = dma.done.wait [#allocation3], 128  }
  0x11   :  { %203 = vsyncadd [#allocation3], 4294967168  ;;  %v205_v0 = vmov 0.0   ;;  %vm206_vm0 = vmmov 0   ;;  %v207_v1 = vmov 0   ;;  %v33_v2 = vld [vmem:[#allocation2] sm:$0xff] }
  0x12   :  { %166 = vmatprep.subr.mxu0 %v205_v0  ;;  %168 = vmatprep.mubr.msk.f32.mxu0 %vm206_vm0, %v205_v0  ;;  %v32_v3 = vld [vmem:[%s265_s0] sm:$0xff]  ;;  %vm128_vm2 = vcmask 64512   ;;  %vm155_vm7 = vcmask 7168  }
  0x13   :  { %175 = vset.pattern.permute.xlu0 %v207_v1  ;;  %167 = vmatpush3.xpose.msra.mxu0 %v33_v2  ;;  %v106_v4 = vmul.f32 %v32_v3, %v32_v3  ;;  %v34_v5 = vld [vmem:[%s268_s3] sm:$0xff] }
  0x14   :  { %v162_v7 = vld [vmem:[%s267_s2] ss:$0 sm:$0xff] }
  0x15   :  { %107 = vadd.xlane.f32.xlu0 %v106_v4  ;;  %v163_v8 = vld [vmem:[%s269_s4] ss:$0 sm:$0xff] }
  0x16   :  { %169 = vmatmul.mubr.f32.vlgmr.msra.gmra.mrb[0].mxu0 %v32_v3 }
  0x2b   :  { %120 = vperm.xlu0 %175, %v34_v5  }
  0xa2   :  { %v108_v6 = vpop.xlane.xlu0 %107 }
  0xa3   :  { %v116_v11 = vadd.f32 %v162_v7, %v108_v6 }
  0xaa   :  { %v121_v9 = vpop.permute.xlu0 %120 }
  0xab   :  { %vm126_vm1 = vcmp.eq.s32.totalorder %v121_v9, %v163_v8 }
  0xe9   :  { %v102_v10 = vpop.f32.mrb[0].mxu0 }
  0xea   :  { %v117_v12 = vmul.f32 2.0, %v102_v10  ;;  %v170_v13 = vpop.f32.mrb[1].mxu0 }
  0xec   :  { %v118_v14 = vsub.f32 %v116_v11, %v117_v12 }
  0xee   :  { %v127_v15 = vsel %vm126_vm1, %v118_v14, -inf  ;;  %v132_v17 = vsel %vm126_vm1, inf, %v118_v14 }
  0xef   :  { %v129_v16 = vsel %vm128_vm2, %v127_v15, -inf  ;;  %v133_v18 = vsel %vm128_vm2, %v132_v17, inf }
  0xf0   :  { %130 = vmax.xlane.f32.xlu1 %v129_v16 }
  0xf4   :  { %134 = vmin.xlane.f32.xlu1 %v133_v18 }
 0x17d   :  { %v131_v19 = vpop.xlane.xlu1 %130 }
 0x17e   :  { %v136_v20 = vmax.f32 %v131_v19, 1e-12 }
 0x180   :  { %176 = vrsqrt.f32 %v136_v20  ;;  %vm139_vm3 = vcmp.eq.f32.partialorder %v136_v20, inf  ;;  %v142_v28 = vand.u32 2147483648, %v136_v20  ;;  %vm141_vm5 = vcmp.eq.f32.partialorder %v136_v20, 0.0 }
 0x181   :  { %v135_v21 = vpop.xlane.xlu1 %134 }
 0x182   :  { %v144_v22 = vmax.f32 %v135_v21, 1e-12 }
 0x184   :  { %178 = vrsqrt.f32 %v144_v22  ;;  %vm147_vm4 = vcmp.eq.f32.partialorder %v144_v22, inf  ;;  %v150_v29 = vand.u32 2147483648, %v144_v22  ;;  %vm149_vm6 = vcmp.eq.f32.partialorder %v144_v22, 0.0 }
 0x18a   :  { %v177_v23 = vpop.eup %176 }
 0x18b   :  { %v138_v24 = vmul.f32 %v177_v23, %v136_v20 }
 0x18d   :  { %v140_v26 = vsel %vm139_vm3, %v136_v20, %v138_v24 }
 0x18e   :  { %v179_v25 = vpop.eup %178  ;;  %v143_v31 = vsel %vm141_vm5, %v142_v28, %v140_v26 }
 0x18f   :  { %v146_v27 = vmul.f32 %v179_v25, %v144_v22 }
 0x191   :  { %v148_v30 = vsel %vm147_vm4, %v144_v22, %v146_v27 }
 0x192   :  { %v151_v32 = vsel %vm149_vm6, %v150_v29, %v148_v30 }
 0x193   :  { %v152_v33 = vsub.f32 %v143_v31, %v151_v32 }
 0x195   :  { %v153_v34 = vadd.f32 0.3, %v152_v33 }
 0x197   :  { %v154_v35 = vmax.f32 %v153_v34, 0.0 }
 0x199   :  { %156 = vst.msk [vmem:[%s270_s5] sm:$0xff] %vm155_vm7, %v154_v35 }
 0x19a   :  { %161 = vsyncpa [#allocation3], 1 }

</bundles_post_ra>
